<compile_context>
chip_gen: v7x
topology: tpu7x:2x2x1
jax: 0.10.0
libtpu: 0.0.40
codegen_flags: <defaults>
</compile_context>

<pallas_src>
import jax
import jax.numpy as jnp
from jax.experimental import pallas as pl
from jax.experimental.pallas import tpu as pltpu

LANE = 128
SUBLANE = 8
_MIB = 1 << 20
_VMEM_BUDGET = 40 * _MIB        # conservative working budget (v7x: 64 MiB / TC physical)
_VMEM_LIMIT_CAP = 56 * _MIB
_MAX_BATCH_TILE = 2048


def _round_up(n, m):
    return (n + m - 1) // m * m


def prepare_fcn_params(w0, wh, beta, param_dtype=jnp.bfloat16):
    """One-time transform of PyTorch-layout params into kernel layout.

    w0:   (h, d_in)          first Linear1d weight
    wh:   (n_hidden, h, h)   remaining Linear1d weights (may be empty)
    beta: (h, out_dim)

    Returns ((w0_t, wh_t, beta_t), (d_in, h, out_dim)): pre-transposed to
    (in_features, out_features), scale-folded in f32, zero-padded to 128-lane
    multiples, then cast to param_dtype (bf16 by default for the bf16 MXU).
    """
    # TODO(synk): consider 256-granularity padding of H/D on v6e/v7x (2x256 MXU) when
    #             the real dims exceed 128; keep 128 on v5e (4x128 MXU).
    h, d_in = w0.shape
    out_dim = beta.shape[1]
    n_hidden = int(wh.shape[0])

    Dp = _round_up(d_in, LANE)
    Hp = _round_up(h, LANE)
    OUTp = _round_up(out_dim, LANE)

    # Fold the Linear1d / beta scaling into the weights (uses ORIGINAL d_in / h).
    w0_t = w0.T.astype(jnp.float32) / jnp.sqrt(jnp.float32(d_in))      # (d_in, h)
    beta_t = beta.astype(jnp.float32) / jnp.float32(h)                 # (h, out_dim)

    w0_t = jnp.pad(w0_t, ((0, Dp - d_in), (0, Hp - h))).astype(param_dtype)
    beta_t = jnp.pad(beta_t, ((0, Hp - h), (0, OUTp - out_dim))).astype(param_dtype)

    if n_hidden:
        wh_t = jnp.swapaxes(wh, -1, -2).astype(jnp.float32) / jnp.sqrt(jnp.float32(h))
        wh_t = jnp.pad(wh_t, ((0, 0), (0, Hp - h), (0, Hp - h))).astype(param_dtype)
    else:
        wh_t = jnp.zeros((0, Hp, Hp), param_dtype)

    return (w0_t, wh_t, beta_t), (d_in, h, out_dim)


def _resident_kernel(n_hidden, compute_dtype):
    """All weights resident in VMEM; one batch tile per grid step."""
    def kernel(x_ref, *refs):
        if n_hidden:
            w0_ref, wh_ref, beta_ref, o_ref = refs
        else:
            w0_ref, beta_ref, o_ref = refs
        x = x_ref[...]
        if x.dtype != compute_dtype:
            x = x.astype(compute_dtype)              # per-tile cast, hidden under matmul
        y = jnp.maximum(
            jnp.dot(x, w0_ref[...], preferred_element_type=jnp.float32), 0.0)
        for l in range(n_hidden):                    # static, small -> unrolled
            y = jnp.maximum(
                jnp.dot(y.astype(compute_dtype), wh_ref[l],
                        preferred_element_type=jnp.float32), 0.0)
        o_ref[...] = jnp.dot(y.astype(compute_dtype), beta_ref[...],
                             preferred_element_type=jnp.float32).astype(o_ref.dtype)
    return kernel


def _streaming_kernel(compute_dtype):
    """Hidden-layer weights streamed over an 'arbitrary' layer grid axis; activation
    carried across it in a VMEM scratch (halves weight VMEM vs full residency)."""
    def kernel(x_ref, w0_ref, wh_ref, beta_ref, o_ref, y_ref):
        l = pl.program_id(1)

        @pl.when(l == 0)
        def _():
            x = x_ref[...]
            if x.dtype != compute_dtype:
                x = x.astype(compute_dtype)
            y_ref[...] = jnp.maximum(
                jnp.dot(x, w0_ref[...], preferred_element_type=jnp.float32),
                0.0).astype(y_ref.dtype)

        y_ref[...] = jnp.maximum(
            jnp.dot(y_ref[...], wh_ref[0], preferred_element_type=jnp.float32),
            0.0).astype(y_ref.dtype)

        @pl.when(l == pl.num_programs(1) - 1)
        def _():
            o_ref[...] = jnp.dot(
                y_ref[...], beta_ref[...],
                preferred_element_type=jnp.float32).astype(o_ref.dtype)
    return kernel


def fcn_forward(x, params, dims, *, batch_tile=None, layer_stream=None):
    """x: (B, C, S) or any (B, ...); flattened to (B, D) like torch.flatten(x, 1)."""
    w0_t, wh_t, beta_t = params
    d_in, h, out_dim = dims
    compute_dtype = w0_t.dtype

    B = x.shape[0]
    xf = x.reshape(B, -1)            # no dtype conversion here (cast per-tile in-kernel)
    assert xf.shape[1] == d_in, (xf.shape, d_in)

    Dp, Hp = w0_t.shape
    OUTp = beta_t.shape[1]
    n_hidden = int(wh_t.shape[0])

    x_bytes = jnp.dtype(xf.dtype).itemsize
    w_bytes = jnp.dtype(compute_dtype).itemsize
    o_bytes = 4                      # f32 output

    resident_w_vmem = (Dp * Hp + n_hidden * Hp * Hp + Hp * OUTp) * w_bytes
    if layer_stream is None:
        # Stream hidden-layer weights only when full residency would eat too much of
        # the VMEM budget (the realistic-H / v7x 64 MiB-per-TC case).
        layer_stream = n_hidden >= 2 and resident_w_vmem > 24 * _MIB
    layer_stream = bool(layer_stream) and n_hidden >= 1

    if layer_stream:
        weight_vmem = (Dp * Hp + Hp * OUTp) * w_bytes + 2 * Hp * Hp * w_bytes
        per_row_vmem = 2 * Dp * x_bytes + 2 * OUTp * o_bytes + Hp * w_bytes
    else:
        weight_vmem = resident_w_vmem
        per_row_vmem = 2 * Dp * x_bytes + 2 * OUTp * o_bytes

    if batch_tile is None:
        avail = max(_VMEM_BUDGET - weight_vmem, 4 * _MIB)
        batch_tile = int(avail // per_row_vmem)
        if B >= 2 * SUBLANE:
            # Keep >= 2 batch steps so v7x's two TensorCores both get work.
            batch_tile = min(batch_tile, _round_up((B + 1) // 2, SUBLANE))
        batch_tile = min(batch_tile, _MAX_BATCH_TILE)

    TB = min(batch_tile, _round_up(B, SUBLANE))
    TB = max(SUBLANE, TB // SUBLANE * SUBLANE)
    Bp = _round_up(B, TB)            # worst-case remainder wastes <= TB-1 rows in the
                                     # last tile; pick batch_tile near a divisor of B
                                     # if that matters.

    if (Bp, Dp) != (B, d_in):
        xp = jnp.pad(xf, ((0, Bp - B), (0, Dp - d_in)))   # only materialize if needed
    else:
        xp = xf

    n_bt = Bp // TB
    flops = 2 * Bp * (Dp * Hp + n_hidden * Hp * Hp + Hp * OUTp)
    wh_reads = n_bt if layer_stream else 1
    bytes_accessed = (xp.size * x_bytes + Bp * OUTp * o_bytes
                      + (w0_t.size + beta_t.size) * w_bytes
                      + wh_reads * wh_t.size * w_bytes)
    vmem_est = weight_vmem + TB * per_row_vmem
    vmem_limit = int(min(max(vmem_est * 1.3 + 2 * _MIB, 32 * _MIB), _VMEM_LIMIT_CAP))

    def call(single_buffer_weights):
        # Grid-invariant weights: single-buffer (double-buffering buys nothing and
        # doubles their VMEM footprint).
        wkw = dict(pipeline_mode=pl.Buffered(1)) if single_buffer_weights else {}
        if layer_stream:
            kernel = _streaming_kernel(compute_dtype)
            grid = (n_bt, n_hidden)
            in_specs = [
                pl.BlockSpec((TB, Dp), lambda i, l: (i, 0)),
                pl.BlockSpec((Dp, Hp), lambda i, l: (0, 0), **wkw),
                pl.BlockSpec((1, Hp, Hp), lambda i, l: (l, 0, 0)),  # streamed (dbl-buf)
                pl.BlockSpec((Hp, OUTp), lambda i, l: (0, 0), **wkw),
            ]
            args = (xp, w0_t, wh_t, beta_t)
            out_specs = pl.BlockSpec((TB, OUTp), lambda i, l: (i, 0))
            scratch_shapes = [pltpu.VMEM((TB, Hp), compute_dtype)]
            dim_sem = ("parallel", "arbitrary")
        else:
            kernel = _resident_kernel(n_hidden, compute_dtype)
            grid = (n_bt,)
            in_specs = [pl.BlockSpec((TB, Dp), lambda i: (i, 0)),
                        pl.BlockSpec((Dp, Hp), lambda i: (0, 0), **wkw)]
            args = [xp, w0_t]
            if n_hidden:
                in_specs.append(
                    pl.BlockSpec((n_hidden, Hp, Hp), lambda i: (0, 0, 0), **wkw))
                args.append(wh_t)
            in_specs.append(pl.BlockSpec((Hp, OUTp), lambda i: (0, 0), **wkw))
            args.append(beta_t)
            args = tuple(args)
            out_specs = pl.BlockSpec((TB, OUTp), lambda i: (i, 0))
            scratch_shapes = []
            dim_sem = ("parallel",)

        return pl.pallas_call(
            kernel,
            out_shape=jax.ShapeDtypeStruct((Bp, OUTp), jnp.float32),
            grid=grid,
            in_specs=in_specs,
            out_specs=out_specs,
            scratch_shapes=scratch_shapes,
            compiler_params=pltpu.CompilerParams(
                dimension_semantics=dim_sem,
                vmem_limit_bytes=vmem_limit),
            cost_estimate=pl.CostEstimate(
                flops=flops, transcendentals=0, bytes_accessed=bytes_accessed),
        )(*args)

    try:
        out = call(True)
    except Exception:
        # Some jax versions reject single-buffered (Buffered(1)) operands; fall back
        # to default double-buffering rather than failing to run.
        out = call(False)

    return out[:B, :out_dim]


def fcn_reference(x, w0, wh, beta):
    """Pure-JAX reference mirroring the PyTorch module exactly (f32)."""
    B = x.shape[0]
    y = x.reshape(B, -1).astype(jnp.float32)
    D = y.shape[1]
    H = w0.shape[0]
    y = jnp.maximum((y @ w0.T) / jnp.sqrt(jnp.float32(D)), 0.0)
    for l in range(wh.shape[0]):
        y = jnp.maximum((y @ wh[l].T) / jnp.sqrt(jnp.float32(H)), 0.0)
    return (y @ beta) / jnp.float32(H)


if __name__ == "__main__":
    # Small, module-consistent shapes:
    #   x: (B=2, C=4, S=16) -> flattened input_channels D = 64
    #   h = 32, out_dim = 8, num_layers = 3 (bias=False, the default)
    B, C, S = 2, 4, 16
    D = C * S
    H = 32
    OUT_DIM = 8
    NUM_LAYERS = 3

    key = jax.random.PRNGKey(0)
    kx, kw0, kwh, kb = jax.random.split(key, 4)

    x = jax.random.normal(kx, (B, C, S), dtype=jnp.float32)
    w0 = jax.random.normal(kw0, (H, D), dtype=jnp.float32)              # Linear1d(D, H)
    wh = jax.random.normal(kwh, (NUM_LAYERS - 1, H, H), jnp.float32)    # Linear1d(H, H) x (L-1)
    beta = jax.random.normal(kb, (H, OUT_DIM), dtype=jnp.float32)

    ref = fcn_reference(x, w0, wh, beta)

    # 1) f32 params (exactness check of the layout/scale-folding/padding).
    params32, dims = prepare_fcn_params(w0, wh, beta, param_dtype=jnp.float32)
    out32 = jax.block_until_ready(fcn_forward(x, params32, dims))
    assert out32.shape == (B, OUT_DIM), out32.shape
    assert jnp.allclose(out32, ref, atol=1e-3, rtol=1e-3), (
        f"f32 max abs err {jnp.max(jnp.abs(out32 - ref))}")

    # 2) bf16 weights (default, bf16 MXU path) with f32 accumulation.
    params16, dims = prepare_fcn_params(w0, wh, beta)
    out16 = jax.block_until_ready(fcn_forward(x, params16, dims))
    assert jnp.allclose(out16, ref, atol=5e-2, rtol=5e-2), (
        f"bf16 max abs err {jnp.max(jnp.abs(out16 - ref))}")

    # 3) Layer-streaming structure (auto-selected at large H; force it here to verify).
    outs = jax.block_until_ready(fcn_forward(x, params16, dims, layer_stream=True))
    assert jnp.allclose(outs, ref, atol=5e-2, rtol=5e-2), (
        f"stream max abs err {jnp.max(jnp.abs(outs - ref))}")

    # 4) num_layers == 1 (no hidden Linear1d layers).
    wh0 = jnp.zeros((0, H, H), jnp.float32)
    ref1 = fcn_reference(x, w0, wh0, beta)
    p1, d1 = prepare_fcn_params(w0, wh0, beta)
    out1 = jax.block_until_ready(fcn_forward(x, p1, d1))
    assert jnp.allclose(out1, ref1, atol=5e-2, rtol=5e-2), (
        f"L1 max abs err {jnp.max(jnp.abs(out1 - ref1))}")

    print("KERNEL_OK")
</pallas_src>

<mosaic_0001>
module attributes {stable_mosaic.version = 11 : i64} {
  func.func @kernel(%arg0: i32, %arg1: memref<8x128xf32, #tpu.memory_space<vmem>>, %arg2: memref<128x128xf32, #tpu.memory_space<vmem>>, %arg3: memref<2x128x128xf32, #tpu.memory_space<vmem>>, %arg4: memref<128x128xf32, #tpu.memory_space<vmem>>, %arg5: memref<8x128xf32, #tpu.memory_space<vmem>>) attributes {dimension_semantics = [#tpu.dimension_semantics<parallel>], iteration_bounds = array<i64: 1>, scalar_prefetch = 0 : i64, scratch_operands = 0 : i64, tpu.core_type = #tpu.core_type<tc>, window_params = [{transform_indices = @transform_0, window_bounds = array<i64: 8, 128>}, {pipeline_mode = #tpu.pipeline_mode<synchronous>, transform_indices = @transform_1, window_bounds = array<i64: 128, 128>}, {pipeline_mode = #tpu.pipeline_mode<synchronous>, transform_indices = @transform_2, window_bounds = array<i64: 2, 128, 128>}, {pipeline_mode = #tpu.pipeline_mode<synchronous>, transform_indices = @transform_3, window_bounds = array<i64: 128, 128>}, {transform_indices = @transform_4, window_bounds = array<i64: 8, 128>}]} {
    %c0 = arith.constant 0 : index
    %c0_0 = arith.constant 0 : index
    %0 = vector.load %arg1[%c0, %c0_0] : memref<8x128xf32, #tpu.memory_space<vmem>>, vector<8x128xf32>
    %c0_1 = arith.constant 0 : index
    %c0_2 = arith.constant 0 : index
    %1 = vector.load %arg2[%c0_1, %c0_2] : memref<128x128xf32, #tpu.memory_space<vmem>>, vector<128x128xf32>
    %cst = arith.constant dense<0.000000e+00> : vector<8x128xf32>
    %2 = tpu.matmul %0, %1, %cst {dimension_numbers = #tpu.dot_dimension_numbers<[1], [0], [0], [1], [0, 0, 1, 1], [], []>} : vector<8x128xf32>, vector<128x128xf32>, vector<8x128xf32> -> vector<8x128xf32>
    %cst_3 = arith.constant 0.000000e+00 : f32
    %3 = vector.broadcast %cst_3 : f32 to vector<8x128xf32>
    %4 = arith.maximumf %2, %3 : vector<8x128xf32>
    %c0_4 = arith.constant 0 : index
    %c0_5 = arith.constant 0 : index
    %c0_6 = arith.constant 0 : index
    %5 = vector.load %arg3[%c0_4, %c0_5, %c0_6] : memref<2x128x128xf32, #tpu.memory_space<vmem>>, vector<1x128x128xf32>
    %6 = vector.shape_cast %5 : vector<1x128x128xf32> to vector<128x128xf32>
    %cst_7 = arith.constant dense<0.000000e+00> : vector<8x128xf32>
    %7 = tpu.matmul %4, %6, %cst_7 {dimension_numbers = #tpu.dot_dimension_numbers<[1], [0], [0], [1], [0, 0, 1, 1], [], []>} : vector<8x128xf32>, vector<128x128xf32>, vector<8x128xf32> -> vector<8x128xf32>
    %cst_8 = arith.constant 0.000000e+00 : f32
    %8 = vector.broadcast %cst_8 : f32 to vector<8x128xf32>
    %9 = arith.maximumf %7, %8 : vector<8x128xf32>
    %c1 = arith.constant 1 : index
    %c0_9 = arith.constant 0 : index
    %c0_10 = arith.constant 0 : index
    %10 = vector.load %arg3[%c1, %c0_9, %c0_10] : memref<2x128x128xf32, #tpu.memory_space<vmem>>, vector<1x128x128xf32>
    %11 = vector.shape_cast %10 : vector<1x128x128xf32> to vector<128x128xf32>
    %cst_11 = arith.constant dense<0.000000e+00> : vector<8x128xf32>
    %12 = tpu.matmul %9, %11, %cst_11 {dimension_numbers = #tpu.dot_dimension_numbers<[1], [0], [0], [1], [0, 0, 1, 1], [], []>} : vector<8x128xf32>, vector<128x128xf32>, vector<8x128xf32> -> vector<8x128xf32>
    %cst_12 = arith.constant 0.000000e+00 : f32
    %13 = vector.broadcast %cst_12 : f32 to vector<8x128xf32>
    %14 = arith.maximumf %12, %13 : vector<8x128xf32>
    %c0_13 = arith.constant 0 : index
    %c0_14 = arith.constant 0 : index
    %15 = vector.load %arg4[%c0_13, %c0_14] : memref<128x128xf32, #tpu.memory_space<vmem>>, vector<128x128xf32>
    %cst_15 = arith.constant dense<0.000000e+00> : vector<8x128xf32>
    %16 = tpu.matmul %14, %15, %cst_15 {dimension_numbers = #tpu.dot_dimension_numbers<[1], [0], [0], [1], [0, 0, 1, 1], [], []>} : vector<8x128xf32>, vector<128x128xf32>, vector<8x128xf32> -> vector<8x128xf32>
    %c0_16 = arith.constant 0 : index
    %c0_17 = arith.constant 0 : index
    %17 = vector.load %arg5[%c0_16, %c0_17] : memref<8x128xf32, #tpu.memory_space<vmem>>, vector<8x128xf32>
    tpu.vector_store %arg5[%c0_16, %c0_17], %16 {strides = array<i32>} : memref<8x128xf32, #tpu.memory_space<vmem>>, vector<8x128xf32>,
    return
  }
  func.func @transform_0(%arg0: i32) -> (i32, i32) {
    %c0_i32 = arith.constant 0 : i32
    %c0_i32_0 = arith.constant 0 : i32
    return %arg0, %c0_i32 : i32, i32
  }
  func.func @transform_1(%arg0: i32) -> (i32, i32) {
    %c0_i32 = arith.constant 0 : i32
    %c0_i32_0 = arith.constant 0 : i32
    %c0_i32_1 = arith.constant 0 : i32
    return %c0_i32, %c0_i32_0 : i32, i32
  }
  func.func @transform_2(%arg0: i32) -> (i32, i32, i32) {
    %c0_i32 = arith.constant 0 : i32
    %c0_i32_0 = arith.constant 0 : i32
    %c0_i32_1 = arith.constant 0 : i32
    %c0_i32_2 = arith.constant 0 : i32
    return %c0_i32, %c0_i32_0, %c0_i32_1 : i32, i32, i32
  }
  func.func @transform_3(%arg0: i32) -> (i32, i32) {
    %c0_i32 = arith.constant 0 : i32
    %c0_i32_0 = arith.constant 0 : i32
    %c0_i32_1 = arith.constant 0 : i32
    return %c0_i32, %c0_i32_0 : i32, i32
  }
  func.func @transform_4(%arg0: i32) -> (i32, i32) {
    %c0_i32 = arith.constant 0 : i32
    %c0_i32_0 = arith.constant 0 : i32
    return %arg0, %c0_i32 : i32, i32
  }
}

module attributes {stable_mosaic.version = 11 : i64} {
  func.func @kernel(%arg0: i32, %arg1: memref<8x128xf32, #tpu.memory_space<vmem>>, %arg2: memref<128x128xf32, #tpu.memory_space<vmem>>, %arg3: memref<2x128x128xf32, #tpu.memory_space<vmem>>, %arg4: memref<128x128xf32, #tpu.memory_space<vmem>>, %arg5: memref<8x128xf32, #tpu.memory_space<vmem>>) attributes {dimension_semantics = [#tpu.dimension_semantics<parallel>], iteration_bounds = array<i64: 1>, scalar_prefetch = 0 : i64, scratch_operands = 0 : i64, tpu.core_type = #tpu.core_type<tc>, window_params = [{transform_indices = @transform_0, window_bounds = array<i64: 8, 128>}, {pipeline_mode = #tpu.pipeline_mode<synchronous>, transform_indices = @transform_1, window_bounds = array<i64: 128, 128>}, {pipeline_mode = #tpu.pipeline_mode<synchronous>, transform_indices = @transform_2, window_bounds = array<i64: 2, 128, 128>}, {pipeline_mode = #tpu.pipeline_mode<synchronous>, transform_indices = @transform_3, window_bounds = array<i64: 128, 128>}, {transform_indices = @transform_4, window_bounds = array<i64: 8, 128>}]} {
    %c0 = arith.constant 0 : index
    %c0_0 = arith.constant 0 : index
    %0 = vector.load %arg1[%c0, %c0_0] : memref<8x128xf32, #tpu.memory_space<vmem>>, vector<8x128xf32>
    %c0_1 = arith.constant 0 : index
    %c0_2 = arith.constant 0 : index
    %1 = vector.load %arg2[%c0_1, %c0_2] : memref<128x128xf32, #tpu.memory_space<vmem>>, vector<128x128xf32>
    %cst = arith.constant dense<0.000000e+00> : vector<8x128xf32>
    %2 = tpu.matmul %0, %1, %cst {dimension_numbers = #tpu.dot_dimension_numbers<[1], [0], [0], [1], [0, 0, 1, 1], [], []>} : vector<8x128xf32>, vector<128x128xf32>, vector<8x128xf32> -> vector<8x128xf32>
    %cst_3 = arith.constant 0.000000e+00 : f32
    %3 = vector.broadcast %cst_3 : f32 to vector<8x128xf32>
    %4 = arith.maximumf %2, %3 : vector<8x128xf32>
    %c0_4 = arith.constant 0 : index
    %c0_5 = arith.constant 0 : index
    %c0_6 = arith.constant 0 : index
    %5 = vector.load %arg3[%c0_4, %c0_5, %c0_6] : memref<2x128x128xf32, #tpu.memory_space<vmem>>, vector<1x128x128xf32>
    %6 = vector.shape_cast %5 : vector<1x128x128xf32> to vector<128x128xf32>
    %cst_7 = arith.constant dense<0.000000e+00> : vector<8x128xf32>
    %7 = tpu.matmul %4, %6, %cst_7 {dimension_numbers = #tpu.dot_dimension_numbers<[1], [0], [0], [1], [0, 0, 1, 1], [], []>} : vector<8x128xf32>, vector<128x128xf32>, vector<8x128xf32> -> vector<8x128xf32>
    %cst_8 = arith.constant 0.000000e+00 : f32
    %8 = vector.broadcast %cst_8 : f32 to vector<8x128xf32>
    %9 = arith.maximumf %7, %8 : vector<8x128xf32>
    %c1 = arith.constant 1 : index
    %c0_9 = arith.constant 0 : index
    %c0_10 = arith.constant 0 : index
    %10 = vector.load %arg3[%c1, %c0_9, %c0_10] : memref<2x128x128xf32, #tpu.memory_space<vmem>>, vector<1x128x128xf32>
    %11 = vector.shape_cast %10 : vector<1x128x128xf32> to vector<128x128xf32>
    %cst_11 = arith.constant dense<0.000000e+00> : vector<8x128xf32>
    %12 = tpu.matmul %9, %11, %cst_11 {dimension_numbers = #tpu.dot_dimension_numbers<[1], [0], [0], [1], [0, 0, 1, 1], [], []>} : vector<8x128xf32>, vector<128x128xf32>, vector<8x128xf32> -> vector<8x128xf32>
    %cst_12 = arith.constant 0.000000e+00 : f32
    %13 = vector.broadcast %cst_12 : f32 to vector<8x128xf32>
    %14 = arith.maximumf %12, %13 : vector<8x128xf32>
    %c0_13 = arith.constant 0 : index
    %c0_14 = arith.constant 0 : index
    %15 = vector.load %arg4[%c0_13, %c0_14] : memref<128x128xf32, #tpu.memory_space<vmem>>, vector<128x128xf32>
    %cst_15 = arith.constant dense<0.000000e+00> : vector<8x128xf32>
    %16 = tpu.matmul %14, %15, %cst_15 {dimension_numbers = #tpu.dot_dimension_numbers<[1], [0], [0], [1], [0, 0, 1, 1], [], []>} : vector<8x128xf32>, vector<128x128xf32>, vector<8x128xf32> -> vector<8x128xf32>
    %c0_16 = arith.constant 0 : index
    %c0_17 = arith.constant 0 : index
    %17 = vector.load %arg5[%c0_16, %c0_17] : memref<8x128xf32, #tpu.memory_space<vmem>>, vector<8x128xf32>
    tpu.vector_store %arg5[%c0_16, %c0_17], %16 {strides = array<i32>} : memref<8x128xf32, #tpu.memory_space<vmem>>, vector<8x128xf32>,
    return
  }
  func.func @transform_0(%arg0: i32) -> (i32, i32) {
    %c0_i32 = arith.constant 0 : i32
    %c0_i32_0 = arith.constant 0 : i32
    return %arg0, %c0_i32 : i32, i32
  }
  func.func @transform_1(%arg0: i32) -> (i32, i32) {
    %c0_i32 = arith.constant 0 : i32
    %c0_i32_0 = arith.constant 0 : i32
    %c0_i32_1 = arith.constant 0 : i32
    return %c0_i32, %c0_i32_0 : i32, i32
  }
  func.func @transform_2(%arg0: i32) -> (i32, i32, i32) {
    %c0_i32 = arith.constant 0 : i32
    %c0_i32_0 = arith.constant 0 : i32
    %c0_i32_1 = arith.constant 0 : i32
    %c0_i32_2 = arith.constant 0 : i32
    return %c0_i32, %c0_i32_0, %c0_i32_1 : i32, i32, i32
  }
  func.func @transform_3(%arg0: i32) -> (i32, i32) {
    %c0_i32 = arith.constant 0 : i32
    %c0_i32_0 = arith.constant 0 : i32
    %c0_i32_1 = arith.constant 0 : i32
    return %c0_i32, %c0_i32_0 : i32, i32
  }
  func.func @transform_4(%arg0: i32) -> (i32, i32) {
    %c0_i32 = arith.constant 0 : i32
    %c0_i32_0 = arith.constant 0 : i32
    return %arg0, %c0_i32 : i32, i32
  }
}

</mosaic_0001>

<bundles_post_ra>
// kernel: tpu_custom_call.1
= control target key start
LH: loop header
LB: loop body
LE: loop exit
PB: predicated region body
PF: predicated region fallthrough
CT: control target
= control target key end

     0   :  { %9 = vsyncpa [#allocation3], 0  ;;  %s1014_s0 = inlined_call_operand.hbm [shape: f32[8,128], index: 0, kind: input, shape index: {}]   ;;  %s1015_s1 = inlined_call_operand.hbm [shape: f32[128,128], index: 1, kind: input, shape index: {}]   ;;  %s1016_s2 = inlined_call_operand.hbm [shape: f32[2,128,128], index: 2, kind: input, shape index: {}]   ;;  %s1017_s3 = inlined_call_operand.hbm [shape: f32[128,128], index: 3, kind: input, shape index: {}]   ;;  %s1018_s4 = inlined_call_operand.hbm [shape: f32[8,128], index: 4, kind: output, shape index: {}]  }
   0x1   :  { %10 = vsyncpa [#allocation6], 0 }
   0x2   :  { %11 = vsyncpa [#allocation9], 0 }
   0x3   :  { %12 = vsyncpa [#allocation4], 0  ;;  %s870_s15 = smov [#allocation5]   ;;  %s752_s19 = scalar_lea.hbm %s1015_s1, 2048 }
   0x4   :  { %s28_s16 = sshll.u32 %s870_s15, 4  ;;  %p753_p0 = scmp.ne.s32.totalorder %s1015_s1, %s752_s19  ;;  %s29_s16 = int_to_ptr.vmem [resolvable:$true] %s28_s16 }
   0x5   :  { %p756_p1 = scmp.lt.u32.totalorder %s752_s19, %s1015_s1 }
   0x7   :  { %p758_p2 = pnand %p756_p1, %p753_p0 }
   0x9   :  { %761 = shalt.err (!%p758_p2)
}
   0xa   :  { %s762_s24 = scalar_lea.vmem %s29_s16, 2048  ;;  %p767_p4 = scmp.lt.s32.totalorder %s29_s16, %s29_s16 }
   0xb   :  { %p763_p3 = scmp.ne.s32.totalorder %s29_s16, %s762_s24  ;;  %p768_p5 = scmp.lt.s32.totalorder %s762_s24, %s762_s24 }
   0xd   :  { %p769_p6 = por %p768_p5, %p767_p4 }
   0xf   :  { %p770_p7 = pnand %p769_p6, %p763_p3 }
  0x11   :  { %773 = shalt.err (!%p770_p7)
}
  0x12   :  { %s871_s25 = smov 128   ;;  %s872_s26 = smov 8  }
  0x13   :  { %34 = dma.hbm_to_vmem [thread:$0]  %s1015_s1, 2048, %s29_s16, [#allocation6], %s871_s25, %s871_s25, %s872_s26  }
  0x14   :  { %s873_s29 = smov [#allocation2]   ;;  %s874_s5 = smov [#allocation7]  }
  0x15   :  { %s19_s30 = sshll.u32 %s873_s29, 4  ;;  %s40_s6 = sshll.u32 %s874_s5, 4  ;;  %s20_s30 = int_to_ptr.vmem [resolvable:$true] %s19_s30  ;;  %s41_s6 = int_to_ptr.vmem [resolvable:$true] %s40_s6 }
  0x16   :  { %s774_s9 = scalar_lea.hbm %s1014_s0, 128 }
  0x17   :  { %p775_p8 = scmp.ne.s32.totalorder %s1014_s0, %s774_s9  ;;  %p778_p9 = scmp.lt.u32.totalorder %s774_s9, %s1014_s0 }
  0x19   :  { %p780_p10 = pnand %p778_p9, %p775_p8 }
  0x1b   :  { %783 = shalt.err (!%p780_p10)
}
  0x1c   :  { %s784_s1 = scalar_lea.vmem %s20_s30, 128  ;;  %p789_p12 = scmp.lt.s32.totalorder %s20_s30, %s20_s30 }
  0x1d   :  { %p785_p11 = scmp.ne.s32.totalorder %s20_s30, %s784_s1  ;;  %p790_p13 = scmp.lt.s32.totalorder %s784_s1, %s784_s1 }
  0x1f   :  { %p791_p0 = por %p790_p13, %p789_p12 }
  0x21   :  { %p792_p1 = pnand %p791_p0, %p785_p11 }
  0x23   :  { %795 = shalt.err (!%p792_p1)
}
  0x24   :  { %22 = dma.hbm_to_vmem [thread:$0]  %s1014_s0, 128, %s20_s30, [#allocation3]  }
  0x25   :  { %s796_s18 = scalar_lea.hbm %s1016_s2, 4096 }
  0x26   :  { %p797_p2 = scmp.ne.s32.totalorder %s1016_s2, %s796_s18  ;;  %p800_p3 = scmp.lt.u32.totalorder %s796_s18, %s1016_s2 }
  0x28   :  { %p802_p4 = pnand %p800_p3, %p797_p2 }
  0x2a   :  { %805 = shalt.err (!%p802_p4)
}
  0x2b   :  { %s806_s23 = scalar_lea.vmem %s41_s6, 4096  ;;  %p811_p6 = scmp.lt.s32.totalorder %s41_s6, %s41_s6 }
  0x2c   :  { %p807_p5 = scmp.ne.s32.totalorder %s41_s6, %s806_s23  ;;  %p812_p7 = scmp.lt.s32.totalorder %s806_s23, %s806_s23 }
  0x2e   :  { %p813_p8 = por %p812_p7, %p811_p6 }
  0x30   :  { %p814_p9 = pnand %p813_p8, %p807_p5 }
  0x32   :  { %817 = shalt.err (!%p814_p9)
}
  0x33   :  { %46 = dma.hbm_to_vmem [thread:$0]  %s1016_s2, 4096, %s41_s6, [#allocation6], %s871_s25, %s871_s25, %s872_s26  }
  0x34   :  { %s875_s27 = smov [#allocation8]   ;;  %s818_s5 = scalar_lea.hbm %s1017_s3, 2048 }
  0x35   :  { %s52_s28 = sshll.u32 %s875_s27, 4  ;;  %p819_p10 = scmp.ne.s32.totalorder %s1017_s3, %s818_s5  ;;  %s53_s28 = int_to_ptr.vmem [resolvable:$true] %s52_s28 }
  0x36   :  { %p822_p11 = scmp.lt.u32.totalorder %s818_s5, %s1017_s3 }
  0x38   :  { %p824_p12 = pnand %p822_p11, %p819_p10 }
  0x3a   :  { %827 = shalt.err (!%p824_p12)
}
  0x3b   :  { %s828_s11 = scalar_lea.vmem %s53_s28, 2048  ;;  %p833_p0 = scmp.lt.s32.totalorder %s53_s28, %s53_s28 }
  0x3c   :  { %p829_p13 = scmp.ne.s32.totalorder %s53_s28, %s828_s11  ;;  %p834_p1 = scmp.lt.s32.totalorder %s828_s11, %s828_s11 }
  0x3e   :  { %p835_p2 = por %p834_p1, %p833_p0 }
  0x40   :  { %p836_p3 = pnand %p835_p2, %p829_p13 }
  0x42   :  { %839 = shalt.err (!%p836_p3)
}
  0x43   :  { %58 = dma.hbm_to_vmem [thread:$0]  %s1017_s3, 2048, %s53_s28, [#allocation9], %s871_s25, %s871_s25, %s872_s26  }
  0x44   :  { %862 = dma.done.wait [#allocation3], 128  }
  0x45   :  { %863 = vsyncadd [#allocation3], 4294967168 }
  0x46   :  { %864 = dma.done.wait [#allocation6], 6144  }
  0x47   :  { %865 = vsyncadd [#allocation6], 4294961152 }
  0x48   :  { %866 = dma.done.wait [#allocation9], 2048  }
  0x49   :  { %867 = vsyncadd [#allocation9], 4294965248  ;;  %v876_v0 = vmov 0.0|0.0   ;;  %vm877_vm0 = vmmov 0   ;;  %v878_v1 = vmov 0.0   ;;  %v72_v2 = vld [vmem:[#allocation5] sm:$0xff] }
  0x4a   :  { %646 = vmatprep.subr.bf16.mxu0 %v876_v0  ;;  %538 = vmatprep.mubr.msk.f32.mxu0 %vm877_vm0, %v878_v1  ;;  %v73_v3 = vld [vmem:[#allocation5 + $0x8] sm:$0xff]  ;;  %v74_v4 = vld [vmem:[#allocation5 + $0x10] sm:$0xff]  ;;  %v75_v6 = vld [vmem:[#allocation5 + $0x18] sm:$0xff]  ;;  %s879_s3 = smov [#allocation10]  }
  0x4b   :  { %670 = vmatprep.subr.bf16.mxu1 %v876_v0  ;;  %573 = vmatprep.mubr.msk.f32.mxu1 %vm877_vm0, %v878_v1  ;;  %v647_v5 = vpack.c.bf16 %v73_v3, %v72_v2  ;;  %v650_v7 = vpack.c.bf16 %v75_v6, %v74_v4  ;;  %v76_v8 = vld [vmem:[#allocation5 + $0x20] sm:$0xff]  ;;  %v77_v9 = vld [vmem:[#allocation5 + $0x28] sm:$0xff]  ;;  %v161_v12 = vld [vmem:[#allocation7 + $0x10] sm:$0xff]  ;;  %s427_s25 = sshll.u32 %s879_s3, 4  ;;  %s428_s25 = int_to_ptr.vmem [resolvable:$true] %s427_s25 }
  0x4c   :  { %v159_v10 = vld [vmem:[#allocation7] sm:$0xff]  ;;  %v160_v11 = vld [vmem:[#allocation7 + $0x8] sm:$0xff]  ;;  %v162_v13 = vld [vmem:[#allocation7 + $0x18] sm:$0xff]  ;;  %v653_v14 = vpack.c.bf16 %v77_v9, %v76_v8  ;;  %s840_s26 = scalar_lea.vmem %s428_s25, 128  ;;  %p845_p5 = scmp.lt.s32.totalorder %s428_s25, %s428_s25 }
  0x4d   :  { %648 = vmatpush3.bf16.msra.mxu0 %v647_v5  ;;  %v671_v15 = vpack.c.bf16 %v160_v11, %v159_v10  ;;  %v78_v16 = vld [vmem:[#allocation5 + $0x30] sm:$0xff]  ;;  %v79_v17 = vld [vmem:[#allocation5 + $0x38] sm:$0xff]  ;;  %v674_v18 = vpack.c.bf16 %v162_v13, %v161_v12  ;;  %v163_v19 = vld [vmem:[#allocation7 + $0x20] sm:$0xff]  ;;  %p841_p4 = scmp.ne.s32.totalorder %s428_s25, %s840_s26  ;;  %p846_p6 = scmp.lt.s32.totalorder %s840_s26, %s840_s26 }
  0x4e   :  { %649 = vmatprep.subr.bf16.mxu0 %v876_v0  ;;  %v164_v20 = vld [vmem:[#allocation7 + $0x28] sm:$0xff]  ;;  %v656_v21 = vpack.c.bf16 %v79_v17, %v78_v16  ;;  %v80_v22 = vld [vmem:[#allocation5 + $0x40] sm:$0xff]  ;;  %v165_v25 = vld [vmem:[#allocation7 + $0x30] sm:$0xff] }
  0x4f   :  { %672 = vmatpush3.bf16.msra.mxu1 %v671_v15  ;;  %v81_v23 = vld [vmem:[#allocation5 + $0x48] sm:$0xff]  ;;  %v677_v24 = vpack.c.bf16 %v164_v20, %v163_v19  ;;  %v166_v26 = vld [vmem:[#allocation7 + $0x38] sm:$0xff]  ;;  %v82_v28 = vld [vmem:[#allocation5 + $0x50] sm:$0xff]  ;;  %p847_p7 = por %p846_p6, %p845_p5 }
  0x50   :  { %673 = vmatprep.subr.bf16.mxu1 %v876_v0  ;;  %v659_v27 = vpack.c.bf16 %v81_v23, %v80_v22  ;;  %v83_v29 = vld [vmem:[#allocation5 + $0x58] sm:$0xff]  ;;  %v680_v30 = vpack.c.bf16 %v166_v26, %v165_v25  ;;  %v167_v31 = vld [vmem:[#allocation7 + $0x40] sm:$0xff]  ;;  %v168_v32 = vld [vmem:[#allocation7 + $0x48] sm:$0xff] }
  0x51   :  { %651 = vmatpush3.bf16.msra.mxu0 %v650_v7  ;;  %v662_v33 = vpack.c.bf16 %v83_v29, %v82_v28  ;;  %v84_v34 = vld [vmem:[#allocation5 + $0x60] sm:$0xff]  ;;  %v85_v35 = vld [vmem:[#allocation5 + $0x68] sm:$0xff]  ;;  %v683_v36 = vpack.c.bf16 %v168_v32, %v167_v31  ;;  %v169_v37 = vld [vmem:[#allocation7 + $0x50] sm:$0xff]  ;;  %p848_p8 = pnand %p847_p7, %p841_p4 }
  0x52   :  { %652 = vmatprep.subr.bf16.mxu0 %v876_v0  ;;  %v170_v38 = vld [vmem:[#allocation7 + $0x58] sm:$0xff]  ;;  %v665_v39 = vpack.c.bf16 %v85_v35, %v84_v34  ;;  %v86_v40 = vld [vmem:[#allocation5 + $0x70] sm:$0xff]  ;;  %v171_v43 = vld [vmem:[#allocation7 + $0x60] sm:$0xff] }
  0x53   :  { %675 = vmatpush3.bf16.msra.mxu1 %v674_v18  ;;  %v87_v41 = vld [vmem:[#allocation5 + $0x78] sm:$0xff]  ;;  %v686_v42 = vpack.c.bf16 %v170_v38, %v169_v37  ;;  %v172_v44 = vld [vmem:[#allocation7 + $0x68] sm:$0xff]  ;;  %v173_v48 = vld [vmem:[#allocation7 + $0x70] sm:$0xff] }
  0x54   :  { %676 = vmatprep.subr.bf16.mxu1 %v876_v0  ;;  %v668_v45 = vpack.c.bf16 %v87_v41, %v86_v40  ;;  %v689_v46 = vpack.c.bf16 %v172_v44, %v171_v43  ;;  %v71_v47 = vld [vmem:[#allocation2] sm:$0xff]  ;;  %v247_v51 = vld [vmem:[#allocation7 + $0x80] sm:$0xff]  ;;  %v248_v52 = vld [vmem:[#allocation7 + $0x88] sm:$0xff] }
  0x55   :  { %654 = vmatpush3.bf16.msra.mxu0 %v653_v14  ;;  %v174_v49 = vld [vmem:[#allocation7 + $0x78] sm:$0xff]  ;;  %v249_v53 = vld [vmem:[#allocation7 + $0x90] sm:$0xff]  ;;  %v695_v54 = vpack.c.bf16 %v248_v52, %v247_v51  ;;  %v251_v57 = vld [vmem:[#allocation7 + $0xa0] sm:$0xff] }
  0x56   :  { %655 = vmatprep.subr.bf16.mxu0 %v876_v0  ;;  %v692_v50 = vpack.c.bf16 %v174_v49, %v173_v48  ;;  %v250_v55 = vld [vmem:[#allocation7 + $0x98] sm:$0xff]  ;;  %v252_v58 = vld [vmem:[#allocation7 + $0xa8] sm:$0xff]  ;;  %v253_v60 = vld [vmem:[#allocation7 + $0xb0] sm:$0xff] }
  0x57   :  { %678 = vmatpush3.bf16.msra.mxu1 %v677_v24  ;;  %v698_v56 = vpack.c.bf16 %v250_v55, %v249_v53  ;;  %v701_v59 = vpack.c.bf16 %v252_v58, %v251_v57  ;;  %v254_v61 = vld [vmem:[#allocation7 + $0xb8] sm:$0xff]  ;;  %v255_v63 = vld [vmem:[#allocation7 + $0xc0] sm:$0xff]  ;;  %v256_v2 = vld [vmem:[#allocation7 + $0xc8] sm:$0xff] }
  0x58   :  { %679 = vmatprep.subr.bf16.mxu1 %v876_v0  ;;  %v704_v62 = vpack.c.bf16 %v254_v61, %v253_v60  ;;  %v707_v3 = vpack.c.bf16 %v256_v2, %v255_v63  ;;  %v257_v4 = vld [vmem:[#allocation7 + $0xd0] sm:$0xff]  ;;  %v258_v5 = vld [vmem:[#allocation7 + $0xd8] sm:$0xff]  ;;  %v259_v7 = vld [vmem:[#allocation7 + $0xe0] sm:$0xff] }
  0x59   :  { %657 = vmatpush3.bf16.msra.mxu0 %v656_v21  ;;  %v710_v6 = vpack.c.bf16 %v258_v5, %v257_v4  ;;  %v260_v8 = vld [vmem:[#allocation7 + $0xe8] sm:$0xff]  ;;  %v261_v13 = vld [vmem:[#allocation7 + $0xf0] sm:$0xff]  ;;  %v262_v14 = vld [vmem:[#allocation7 + $0xf8] sm:$0xff] }
  0x5a   :  { %658 = vmatprep.subr.bf16.mxu0 %v876_v0  ;;  %v713_v9 = vpack.c.bf16 %v260_v8, %v259_v7  ;;  %v716_v15 = vpack.c.bf16 %v262_v14, %v261_v13  ;;  %v334_v16 = vld [vmem:[#allocation8] sm:$0xff]  ;;  %v335_v17 = vld [vmem:[#allocation8 + $0x8] sm:$0xff]  ;;  %v336_v18 = vld [vmem:[#allocation8 + $0x10] sm:$0xff] }
  0x5b   :  { %681 = vmatpush3.bf16.msra.mxu1 %v680_v30  ;;  %v719_v19 = vpack.c.bf16 %v335_v17, %v334_v16  ;;  %v337_v20 = vld [vmem:[#allocation8 + $0x18] sm:$0xff]  ;;  %v338_v22 = vld [vmem:[#allocation8 + $0x20] sm:$0xff]  ;;  %v339_v23 = vld [vmem:[#allocation8 + $0x28] sm:$0xff] }
  0x5c   :  { %682 = vmatprep.subr.bf16.mxu1 %v876_v0  ;;  %v722_v21 = vpack.c.bf16 %v337_v20, %v336_v18  ;;  %v725_v24 = vpack.c.bf16 %v339_v23, %v338_v22  ;;  %v341_v25 = vld [vmem:[#allocation8 + $0x38] sm:$0xff]  ;;  %v343_v28 = vld [vmem:[#allocation8 + $0x48] sm:$0xff]  ;;  %v344_v30 = vld [vmem:[#allocation8 + $0x50] sm:$0xff] }
  0x5d   :  { %660 = vmatpush3.bf16.msra.mxu0 %v659_v27  ;;  %v342_v27 = vld [vmem:[#allocation8 + $0x40] sm:$0xff]  ;;  %v345_v31 = vld [vmem:[#allocation8 + $0x58] sm:$0xff]  ;;  %v347_v34 = vld [vmem:[#allocation8 + $0x68] sm:$0xff] }
  0x5e   :  { %661 = vmatprep.subr.bf16.mxu0 %v876_v0  ;;  %v731_v29 = vpack.c.bf16 %v343_v28, %v342_v27  ;;  %v734_v32 = vpack.c.bf16 %v345_v31, %v344_v30  ;;  %v349_v40 = vld [vmem:[#allocation8 + $0x78] sm:$0xff] }
  0x5f   :  { %684 = vmatpush3.bf16.msra.mxu1 %v683_v36 }
  0x60   :  { %685 = vmatprep.subr.bf16.mxu1 %v876_v0 }
  0x61   :  { %663 = vmatpush3.bf16.msra.mxu0 %v662_v33  ;;  %v346_v33 = vld [vmem:[#allocation8 + $0x60] sm:$0xff] }
  0x62   :  { %664 = vmatprep.subr.bf16.mxu0 %v876_v0  ;;  %v737_v35 = vpack.c.bf16 %v347_v34, %v346_v33 }
  0x63   :  { %687 = vmatpush3.bf16.msra.mxu1 %v686_v42 }
  0x64   :  { %688 = vmatprep.subr.bf16.mxu1 %v876_v0 }
  0x65   :  { %666 = vmatpush3.bf16.msra.mxu0 %v665_v39  ;;  %v348_v39 = vld [vmem:[#allocation8 + $0x70] sm:$0xff] }
  0x66   :  { %667 = vmatprep.subr.bf16.mxu0 %v876_v0  ;;  %v740_v41 = vpack.c.bf16 %v349_v40, %v348_v39 }
  0x67   :  { %690 = vmatpush3.bf16.msra.mxu1 %v689_v46 }
  0x68   :  { %691 = vmatprep.subr.bf16.mxu1 %v876_v0 }
  0x69   :  { %669 = vmatpush3.bf16.msra.mxu0 %v668_v45 }
  0x6a   :  { %694 = vmatprep.subr.bf16.mxu0 %v876_v0 }
  0x6b   :  { %693 = vmatpush3.bf16.msra.mxu1 %v692_v50 }
  0x6c   :  { %539 = vmatmul.mubr.f32.vlgmr.msra.gmra.mrb[0].mxu0 %v71_v47  ;;  %718 = vmatprep.subr.bf16.mxu1 %v876_v0 }
  0x6d   :  { %608 = vmatprep.mubr.msk.f32.mxu0 %vm877_vm0, %v878_v1  ;;  %696 = vmatpush3.bf16.msra.mxu0 %v695_v54 }
  0x6e   :  { %697 = vmatprep.subr.bf16.mxu0 %v876_v0 }
  0x71   :  { %699 = vmatpush3.bf16.msra.mxu0 %v698_v56 }
  0x72   :  { %700 = vmatprep.subr.bf16.mxu0 %v876_v0 }
  0x75   :  { %702 = vmatpush3.bf16.msra.mxu0 %v701_v59 }
  0x76   :  { %703 = vmatprep.subr.bf16.mxu0 %v876_v0 }
  0x79   :  { %705 = vmatpush3.bf16.msra.mxu0 %v704_v62 }
  0x7a   :  { %706 = vmatprep.subr.bf16.mxu0 %v876_v0 }
  0x7d   :  { %708 = vmatpush3.bf16.msra.mxu0 %v707_v3 }
  0x7e   :  { %709 = vmatprep.subr.bf16.mxu0 %v876_v0 }
  0x81   :  { %711 = vmatpush3.bf16.msra.mxu0 %v710_v6 }
  0x82   :  { %712 = vmatprep.subr.bf16.mxu0 %v876_v0 }
  0x85   :  { %714 = vmatpush3.bf16.msra.mxu0 %v713_v9 }
  0x86   :  { %715 = vmatprep.subr.bf16.mxu0 %v876_v0 }
  0x89   :  { %717 = vmatpush3.bf16.msra.mxu0 %v716_v15 }
 0x13f   :  { %v154_v10 = vpop.f32.mrb[0].mxu0 }
 0x140   :  { %v158_v11 = vmax.f32 %v154_v10, 0.0  ;;  %v540_v12 = vpop.f32.mrb[1].mxu0 }
 0x142   :  { %574 = vmatmul.mubr.f32.vlgmr.msra.gmra.mrb[0].mxu1 %v158_v11 }
 0x143   :  { %643 = vmatprep.mubr.msk.f32.mxu1 %vm877_vm0, %v878_v1  ;;  %720 = vmatpush3.bf16.msra.mxu1 %v719_v19  ;;  %v340_v1 = vld [vmem:[#allocation8 + $0x30] sm:$0xff] }
 0x144   :  { %721 = vmatprep.subr.bf16.mxu1 %v876_v0  ;;  %v728_v26 = vpack.c.bf16 %v341_v25, %v340_v1 }
 0x147   :  { %723 = vmatpush3.bf16.msra.mxu1 %v722_v21 }
 0x148   :  { %724 = vmatprep.subr.bf16.mxu1 %v876_v0 }
 0x14b   :  { %726 = vmatpush3.bf16.msra.mxu1 %v725_v24 }
 0x14c   :  { %727 = vmatprep.subr.bf16.mxu1 %v876_v0 }
 0x14f   :  { %729 = vmatpush3.bf16.msra.mxu1 %v728_v26 }
 0x150   :  { %730 = vmatprep.subr.bf16.mxu1 %v876_v0 }
 0x153   :  { %732 = vmatpush3.bf16.msra.mxu1 %v731_v29 }
 0x154   :  { %733 = vmatprep.subr.bf16.mxu1 %v876_v0 }
 0x157   :  { %735 = vmatpush3.bf16.msra.mxu1 %v734_v32 }
 0x158   :  { %736 = vmatprep.subr.bf16.mxu1 %v876_v0 }
 0x15b   :  { %738 = vmatpush3.bf16.msra.mxu1 %v737_v35 }
 0x15c   :  { %739 = vmatprep.subr.bf16.mxu1 %v876_v0 }
 0x15f   :  { %741 = vmatpush3.bf16.msra.mxu1 %v740_v41 }
 0x215   :  { %v241_v36 = vpop.f32.mrb[0].mxu1 }
 0x216   :  { %v245_v37 = vmax.f32 %v241_v36, 0.0  ;;  %v575_v38 = vpop.f32.mrb[1].mxu1 }
 0x218   :  { %609 = vmatmul.mubr.f32.vlgmr.msra.gmra.mrb[2].mxu0 %v245_v37 }
 0x2eb   :  { %v329_v42 = vpop.f32.mrb[2].mxu0 }
 0x2ec   :  { %v333_v43 = vmax.f32 %v329_v42, 0.0  ;;  %v610_v44 = vpop.f32.mrb[3].mxu0 }
 0x2ee   :  { %644 = vmatmul.mubr.f32.vlgmr.msra.gmra.mrb[2].mxu1 %v333_v43 }
 0x3c1   :  { %v416_v45 = vpop.f32.mrb[2].mxu1 }
 0x3c2   :  { %420 = vst [vmem:[#allocation10] sm:$0xff] %v416_v45  ;;  %v645_v46 = vpop.f32.mrb[3].mxu1 }
 0x3c3   :  { %851 = shalt.err (!%p848_p8)
}
 0x3c4   :  { %s852_s1 = scalar_lea.hbm %s1018_s4, 128 }
 0x3c5   :  { %p853_p9 = scmp.ne.s32.totalorder %s1018_s4, %s852_s1  ;;  %p856_p10 = scmp.lt.u32.totalorder %s852_s1, %s1018_s4 }
 0x3c7   :  { %p858_p11 = pnand %p856_p10, %p853_p9 }
 0x3c9   :  { %861 = shalt.err (!%p858_p11)
}
 0x3ca   :  { %430 = dma.vmem_to_hbm [thread:$0]  %s428_s25, 128, %s1018_s4, [#allocation4]  }
 0x3cb   :  { %868 = dma.done.wait [#allocation4], 128  }
 0x3cc   :  { %869 = vsyncadd [#allocation4], 4294967168 }
 0x3cd   :  { %434 = vsyncpa [#allocation3], 1 }
 0x3ce   :  { %435 = vsyncpa [#allocation6], 1 }
 0x3cf   :  { %436 = vsyncpa [#allocation9], 1 }
 0x3d0   :  { %437 = vsyncpa [#allocation4], 1 }

// kernel: tpu_custom_call.1
= control target key start
LH: loop header
LB: loop body
LE: loop exit
PB: predicated region body
PF: predicated region fallthrough
CT: control target
= control target key end

     0   :  { %9 = vsyncpa [#allocation3], 0  ;;  %s1014_s0 = inlined_call_operand.hbm [shape: f32[8,128], index: 0, kind: input, shape index: {}]   ;;  %s1015_s1 = inlined_call_operand.hbm [shape: f32[128,128], index: 1, kind: input, shape index: {}]   ;;  %s1016_s2 = inlined_call_operand.hbm [shape: f32[2,128,128], index: 2, kind: input, shape index: {}]   ;;  %s1017_s3 = inlined_call_operand.hbm [shape: f32[128,128], index: 3, kind: input, shape index: {}]   ;;  %s1018_s4 = inlined_call_operand.hbm [shape: f32[8,128], index: 4, kind: output, shape index: {}]  }
   0x1   :  { %10 = vsyncpa [#allocation6], 0 }
   0x2   :  { %11 = vsyncpa [#allocation9], 0 }
   0x3   :  { %12 = vsyncpa [#allocation4], 0  ;;  %s870_s15 = smov [#allocation5]   ;;  %s752_s19 = scalar_lea.hbm %s1015_s1, 2048 }
   0x4   :  { %s28_s16 = sshll.u32 %s870_s15, 4  ;;  %p753_p0 = scmp.ne.s32.totalorder %s1015_s1, %s752_s19  ;;  %s29_s16 = int_to_ptr.vmem [resolvable:$true] %s28_s16 }
   0x5   :  { %p756_p1 = scmp.lt.u32.totalorder %s752_s19, %s1015_s1 }
   0x7   :  { %p758_p2 = pnand %p756_p1, %p753_p0 }
   0x9   :  { %761 = shalt.err (!%p758_p2)
}
   0xa   :  { %s762_s24 = scalar_lea.vmem %s29_s16, 2048  ;;  %p767_p4 = scmp.lt.s32.totalorder %s29_s16, %s29_s16 }
   0xb   :  { %p763_p3 = scmp.ne.s32.totalorder %s29_s16, %s762_s24  ;;  %p768_p5 = scmp.lt.s32.totalorder %s762_s24, %s762_s24 }
   0xd   :  { %p769_p6 = por %p768_p5, %p767_p4 }
   0xf   :  { %p770_p7 = pnand %p769_p6, %p763_p3 }
  0x11   :  { %773 = shalt.err (!%p770_p7)
}
  0x12   :  { %s871_s25 = smov 128   ;;  %s872_s26 = smov 8  }
  0x13   :  { %34 = dma.hbm_to_vmem [thread:$0]  %s1015_s1, 2048, %s29_s16, [#allocation6], %s871_s25, %s871_s25, %s872_s26  }
  0x14   :  { %s873_s29 = smov [#allocation2]   ;;  %s874_s5 = smov [#allocation7]  }
  0x15   :  { %s19_s30 = sshll.u32 %s873_s29, 4  ;;  %s40_s6 = sshll.u32 %s874_s5, 4  ;;  %s20_s30 = int_to_ptr.vmem [resolvable:$true] %s19_s30  ;;  %s41_s6 = int_to_ptr.vmem [resolvable:$true] %s40_s6 }
  0x16   :  { %s774_s9 = scalar_lea.hbm %s1014_s0, 128 }
  0x17   :  { %p775_p8 = scmp.ne.s32.totalorder %s1014_s0, %s774_s9  ;;  %p778_p9 = scmp.lt.u32.totalorder %s774_s9, %s1014_s0 }
  0x19   :  { %p780_p10 = pnand %p778_p9, %p775_p8 }
  0x1b   :  { %783 = shalt.err (!%p780_p10)
}
  0x1c   :  { %s784_s1 = scalar_lea.vmem %s20_s30, 128  ;;  %p789_p12 = scmp.lt.s32.totalorder %s20_s30, %s20_s30 }
  0x1d   :  { %p785_p11 = scmp.ne.s32.totalorder %s20_s30, %s784_s1  ;;  %p790_p13 = scmp.lt.s32.totalorder %s784_s1, %s784_s1 }
  0x1f   :  { %p791_p0 = por %p790_p13, %p789_p12 }
  0x21   :  { %p792_p1 = pnand %p791_p0, %p785_p11 }
  0x23   :  { %795 = shalt.err (!%p792_p1)
}
  0x24   :  { %22 = dma.hbm_to_vmem [thread:$0]  %s1014_s0, 128, %s20_s30, [#allocation3]  }
  0x25   :  { %s796_s18 = scalar_lea.hbm %s1016_s2, 4096 }
  0x26   :  { %p797_p2 = scmp.ne.s32.totalorder %s1016_s2, %s796_s18  ;;  %p800_p3 = scmp.lt.u32.totalorder %s796_s18, %s1016_s2 }
  0x28   :  { %p802_p4 = pnand %p800_p3, %p797_p2 }
  0x2a   :  { %805 = shalt.err (!%p802_p4)
}
  0x2b   :  { %s806_s23 = scalar_lea.vmem %s41_s6, 4096  ;;  %p811_p6 = scmp.lt.s32.totalorder %s41_s6, %s41_s6 }
  0x2c   :  { %p807_p5 = scmp.ne.s32.totalorder %s41_s6, %s806_s23  ;;  %p812_p7 = scmp.lt.s32.totalorder %s806_s23, %s806_s23 }
  0x2e   :  { %p813_p8 = por %p812_p7, %p811_p6 }
  0x30   :  { %p814_p9 = pnand %p813_p8, %p807_p5 }
  0x32   :  { %817 = shalt.err (!%p814_p9)
}
  0x33   :  { %46 = dma.hbm_to_vmem [thread:$0]  %s1016_s2, 4096, %s41_s6, [#allocation6], %s871_s25, %s871_s25, %s872_s26  }
  0x34   :  { %s875_s27 = smov [#allocation8]   ;;  %s818_s5 = scalar_lea.hbm %s1017_s3, 2048 }
  0x35   :  { %s52_s28 = sshll.u32 %s875_s27, 4  ;;  %p819_p10 = scmp.ne.s32.totalorder %s1017_s3, %s818_s5  ;;  %s53_s28 = int_to_ptr.vmem [resolvable:$true] %s52_s28 }
  0x36   :  { %p822_p11 = scmp.lt.u32.totalorder %s818_s5, %s1017_s3 }
  0x38   :  { %p824_p12 = pnand %p822_p11, %p819_p10 }
  0x3a   :  { %827 = shalt.err (!%p824_p12)
}
  0x3b   :  { %s828_s11 = scalar_lea.vmem %s53_s28, 2048  ;;  %p833_p0 = scmp.lt.s32.totalorder %s53_s28, %s53_s28 }
  0x3c   :  { %p829_p13 = scmp.ne.s32.totalorder %s53_s28, %s828_s11  ;;  %p834_p1 = scmp.lt.s32.totalorder %s828_s11, %s828_s11 }
  0x3e   :  { %p835_p2 = por %p834_p1, %p833_p0 }
  0x40   :  { %p836_p3 = pnand %p835_p2, %p829_p13 }
  0x42   :  { %839 = shalt.err (!%p836_p3)
}
  0x43   :  { %58 = dma.hbm_to_vmem [thread:$0]  %s1017_s3, 2048, %s53_s28, [#allocation9], %s871_s25, %s871_s25, %s872_s26  }
  0x44   :  { %862 = dma.done.wait [#allocation3], 128  }
  0x45   :  { %863 = vsyncadd [#allocation3], 4294967168 }
  0x46   :  { %864 = dma.done.wait [#allocation6], 6144  }
  0x47   :  { %865 = vsyncadd [#allocation6], 4294961152 }
  0x48   :  { %866 = dma.done.wait [#allocation9], 2048  }
  0x49   :  { %867 = vsyncadd [#allocation9], 4294965248  ;;  %v876_v0 = vmov 0.0|0.0   ;;  %vm877_vm0 = vmmov 0   ;;  %v878_v1 = vmov 0.0   ;;  %v72_v2 = vld [vmem:[#allocation5] sm:$0xff] }
  0x4a   :  { %646 = vmatprep.subr.bf16.mxu0 %v876_v0  ;;  %538 = vmatprep.mubr.msk.f32.mxu0 %vm877_vm0, %v878_v1  ;;  %v73_v3 = vld [vmem:[#allocation5 + $0x8] sm:$0xff]  ;;  %v74_v4 = vld [vmem:[#allocation5 + $0x10] sm:$0xff]  ;;  %v75_v6 = vld [vmem:[#allocation5 + $0x18] sm:$0xff]  ;;  %s879_s3 = smov [#allocation10]  }
  0x4b   :  { %670 = vmatprep.subr.bf16.mxu1 %v876_v0  ;;  %573 = vmatprep.mubr.msk.f32.mxu1 %vm877_vm0, %v878_v1  ;;  %v647_v5 = vpack.c.bf16 %v73_v3, %v72_v2  ;;  %v650_v7 = vpack.c.bf16 %v75_v6, %v74_v4  ;;  %v76_v8 = vld [vmem:[#allocation5 + $0x20] sm:$0xff]  ;;  %v77_v9 = vld [vmem:[#allocation5 + $0x28] sm:$0xff]  ;;  %v161_v12 = vld [vmem:[#allocation7 + $0x10] sm:$0xff]  ;;  %s427_s25 = sshll.u32 %s879_s3, 4  ;;  %s428_s25 = int_to_ptr.vmem [resolvable:$true] %s427_s25 }
  0x4c   :  { %v159_v10 = vld [vmem:[#allocation7] sm:$0xff]  ;;  %v160_v11 = vld [vmem:[#allocation7 + $0x8] sm:$0xff]  ;;  %v162_v13 = vld [vmem:[#allocation7 + $0x18] sm:$0xff]  ;;  %v653_v14 = vpack.c.bf16 %v77_v9, %v76_v8  ;;  %s840_s26 = scalar_lea.vmem %s428_s25, 128  ;;  %p845_p5 = scmp.lt.s32.totalorder %s428_s25, %s428_s25 }
  0x4d   :  { %648 = vmatpush3.bf16.msra.mxu0 %v647_v5  ;;  %v671_v15 = vpack.c.bf16 %v160_v11, %v159_v10  ;;  %v78_v16 = vld [vmem:[#allocation5 + $0x30] sm:$0xff]  ;;  %v79_v17 = vld [vmem:[#allocation5 + $0x38] sm:$0xff]  ;;  %v674_v18 = vpack.c.bf16 %v162_v13, %v161_v12  ;;  %v163_v19 = vld [vmem:[#allocation7 + $0x20] sm:$0xff]  ;;  %p841_p4 = scmp.ne.s32.totalorder %s428_s25, %s840_s26  ;;  %p846_p6 = scmp.lt.s32.totalorder %s840_s26, %s840_s26 }
  0x4e   :  { %649 = vmatprep.subr.bf16.mxu0 %v876_v0  ;;  %v164_v20 = vld [vmem:[#allocation7 + $0x28] sm:$0xff]  ;;  %v656_v21 = vpack.c.bf16 %v79_v17, %v78_v16  ;;  %v80_v22 = vld [vmem:[#allocation5 + $0x40] sm:$0xff]  ;;  %v165_v25 = vld [vmem:[#allocation7 + $0x30] sm:$0xff] }
  0x4f   :  { %672 = vmatpush3.bf16.msra.mxu1 %v671_v15  ;;  %v81_v23 = vld [vmem:[#allocation5 + $0x48] sm:$0xff]  ;;  %v677_v24 = vpack.c.bf16 %v164_v20, %v163_v19  ;;  %v166_v26 = vld [vmem:[#allocation7 + $0x38] sm:$0xff]  ;;  %v82_v28 = vld [vmem:[#allocation5 + $0x50] sm:$0xff]  ;;  %p847_p7 = por %p846_p6, %p845_p5 }
  0x50   :  { %673 = vmatprep.subr.bf16.mxu1 %v876_v0  ;;  %v659_v27 = vpack.c.bf16 %v81_v23, %v80_v22  ;;  %v83_v29 = vld [vmem:[#allocation5 + $0x58] sm:$0xff]  ;;  %v680_v30 = vpack.c.bf16 %v166_v26, %v165_v25  ;;  %v167_v31 = vld [vmem:[#allocation7 + $0x40] sm:$0xff]  ;;  %v168_v32 = vld [vmem:[#allocation7 + $0x48] sm:$0xff] }
  0x51   :  { %651 = vmatpush3.bf16.msra.mxu0 %v650_v7  ;;  %v662_v33 = vpack.c.bf16 %v83_v29, %v82_v28  ;;  %v84_v34 = vld [vmem:[#allocation5 + $0x60] sm:$0xff]  ;;  %v85_v35 = vld [vmem:[#allocation5 + $0x68] sm:$0xff]  ;;  %v683_v36 = vpack.c.bf16 %v168_v32, %v167_v31  ;;  %v169_v37 = vld [vmem:[#allocation7 + $0x50] sm:$0xff]  ;;  %p848_p8 = pnand %p847_p7, %p841_p4 }
  0x52   :  { %652 = vmatprep.subr.bf16.mxu0 %v876_v0  ;;  %v170_v38 = vld [vmem:[#allocation7 + $0x58] sm:$0xff]  ;;  %v665_v39 = vpack.c.bf16 %v85_v35, %v84_v34  ;;  %v86_v40 = vld [vmem:[#allocation5 + $0x70] sm:$0xff]  ;;  %v171_v43 = vld [vmem:[#allocation7 + $0x60] sm:$0xff] }
  0x53   :  { %675 = vmatpush3.bf16.msra.mxu1 %v674_v18  ;;  %v87_v41 = vld [vmem:[#allocation5 + $0x78] sm:$0xff]  ;;  %v686_v42 = vpack.c.bf16 %v170_v38, %v169_v37  ;;  %v172_v44 = vld [vmem:[#allocation7 + $0x68] sm:$0xff]  ;;  %v173_v48 = vld [vmem:[#allocation7 + $0x70] sm:$0xff] }
  0x54   :  { %676 = vmatprep.subr.bf16.mxu1 %v876_v0  ;;  %v668_v45 = vpack.c.bf16 %v87_v41, %v86_v40  ;;  %v689_v46 = vpack.c.bf16 %v172_v44, %v171_v43  ;;  %v71_v47 = vld [vmem:[#allocation2] sm:$0xff]  ;;  %v247_v51 = vld [vmem:[#allocation7 + $0x80] sm:$0xff]  ;;  %v248_v52 = vld [vmem:[#allocation7 + $0x88] sm:$0xff] }
  0x55   :  { %654 = vmatpush3.bf16.msra.mxu0 %v653_v14  ;;  %v174_v49 = vld [vmem:[#allocation7 + $0x78] sm:$0xff]  ;;  %v249_v53 = vld [vmem:[#allocation7 + $0x90] sm:$0xff]  ;;  %v695_v54 = vpack.c.bf16 %v248_v52, %v247_v51  ;;  %v251_v57 = vld [vmem:[#allocation7 + $0xa0] sm:$0xff] }
  0x56   :  { %655 = vmatprep.subr.bf16.mxu0 %v876_v0  ;;  %v692_v50 = vpack.c.bf16 %v174_v49, %v173_v48  ;;  %v250_v55 = vld [vmem:[#allocation7 + $0x98] sm:$0xff]  ;;  %v252_v58 = vld [vmem:[#allocation7 + $0xa8] sm:$0xff]  ;;  %v253_v60 = vld [vmem:[#allocation7 + $0xb0] sm:$0xff] }
  0x57   :  { %678 = vmatpush3.bf16.msra.mxu1 %v677_v24  ;;  %v698_v56 = vpack.c.bf16 %v250_v55, %v249_v53  ;;  %v701_v59 = vpack.c.bf16 %v252_v58, %v251_v57  ;;  %v254_v61 = vld [vmem:[#allocation7 + $0xb8] sm:$0xff]  ;;  %v255_v63 = vld [vmem:[#allocation7 + $0xc0] sm:$0xff]  ;;  %v256_v2 = vld [vmem:[#allocation7 + $0xc8] sm:$0xff] }
  0x58   :  { %679 = vmatprep.subr.bf16.mxu1 %v876_v0  ;;  %v704_v62 = vpack.c.bf16 %v254_v61, %v253_v60  ;;  %v707_v3 = vpack.c.bf16 %v256_v2, %v255_v63  ;;  %v257_v4 = vld [vmem:[#allocation7 + $0xd0] sm:$0xff]  ;;  %v258_v5 = vld [vmem:[#allocation7 + $0xd8] sm:$0xff]  ;;  %v259_v7 = vld [vmem:[#allocation7 + $0xe0] sm:$0xff] }
  0x59   :  { %657 = vmatpush3.bf16.msra.mxu0 %v656_v21  ;;  %v710_v6 = vpack.c.bf16 %v258_v5, %v257_v4  ;;  %v260_v8 = vld [vmem:[#allocation7 + $0xe8] sm:$0xff]  ;;  %v261_v13 = vld [vmem:[#allocation7 + $0xf0] sm:$0xff]  ;;  %v262_v14 = vld [vmem:[#allocation7 + $0xf8] sm:$0xff] }
  0x5a   :  { %658 = vmatprep.subr.bf16.mxu0 %v876_v0  ;;  %v713_v9 = vpack.c.bf16 %v260_v8, %v259_v7  ;;  %v716_v15 = vpack.c.bf16 %v262_v14, %v261_v13  ;;  %v334_v16 = vld [vmem:[#allocation8] sm:$0xff]  ;;  %v335_v17 = vld [vmem:[#allocation8 + $0x8] sm:$0xff]  ;;  %v336_v18 = vld [vmem:[#allocation8 + $0x10] sm:$0xff] }
  0x5b   :  { %681 = vmatpush3.bf16.msra.mxu1 %v680_v30  ;;  %v719_v19 = vpack.c.bf16 %v335_v17, %v334_v16  ;;  %v337_v20 = vld [vmem:[#allocation8 + $0x18] sm:$0xff]  ;;  %v338_v22 = vld [vmem:[#allocation8 + $0x20] sm:$0xff]  ;;  %v339_v23 = vld [vmem:[#allocation8 + $0x28] sm:$0xff] }
  0x5c   :  { %682 = vmatprep.subr.bf16.mxu1 %v876_v0  ;;  %v722_v21 = vpack.c.bf16 %v337_v20, %v336_v18  ;;  %v725_v24 = vpack.c.bf16 %v339_v23, %v338_v22  ;;  %v341_v25 = vld [vmem:[#allocation8 + $0x38] sm:$0xff]  ;;  %v343_v28 = vld [vmem:[#allocation8 + $0x48] sm:$0xff]  ;;  %v344_v30 = vld [vmem:[#allocation8 + $0x50] sm:$0xff] }
  0x5d   :  { %660 = vmatpush3.bf16.msra.mxu0 %v659_v27  ;;  %v342_v27 = vld [vmem:[#allocation8 + $0x40] sm:$0xff]  ;;  %v345_v31 = vld [vmem:[#allocation8 + $0x58] sm:$0xff]  ;;  %v347_v34 = vld [vmem:[#allocation8 + $0x68] sm:$0xff] }
  0x5e   :  { %661 = vmatprep.subr.bf16.mxu0 %v876_v0  ;;  %v731_v29 = vpack.c.bf16 %v343_v28, %v342_v27  ;;  %v734_v32 = vpack.c.bf16 %v345_v31, %v344_v30  ;;  %v349_v40 = vld [vmem:[#allocation8 + $0x78] sm:$0xff] }
  0x5f   :  { %684 = vmatpush3.bf16.msra.mxu1 %v683_v36 }
  0x60   :  { %685 = vmatprep.subr.bf16.mxu1 %v876_v0 }
  0x61   :  { %663 = vmatpush3.bf16.msra.mxu0 %v662_v33  ;;  %v346_v33 = vld [vmem:[#allocation8 + $0x60] sm:$0xff] }
  0x62   :  { %664 = vmatprep.subr.bf16.mxu0 %v876_v0  ;;  %v737_v35 = vpack.c.bf16 %v347_v34, %v346_v33 }
  0x63   :  { %687 = vmatpush3.bf16.msra.mxu1 %v686_v42 }
  0x64   :  { %688 = vmatprep.subr.bf16.mxu1 %v876_v0 }
  0x65   :  { %666 = vmatpush3.bf16.msra.mxu0 %v665_v39  ;;  %v348_v39 = vld [vmem:[#allocation8 + $0x70] sm:$0xff] }
  0x66   :  { %667 = vmatprep.subr.bf16.mxu0 %v876_v0  ;;  %v740_v41 = vpack.c.bf16 %v349_v40, %v348_v39 }
  0x67   :  { %690 = vmatpush3.bf16.msra.mxu1 %v689_v46 }
  0x68   :  { %691 = vmatprep.subr.bf16.mxu1 %v876_v0 }
  0x69   :  { %669 = vmatpush3.bf16.msra.mxu0 %v668_v45 }
  0x6a   :  { %694 = vmatprep.subr.bf16.mxu0 %v876_v0 }
  0x6b   :  { %693 = vmatpush3.bf16.msra.mxu1 %v692_v50 }
  0x6c   :  { %539 = vmatmul.mubr.f32.vlgmr.msra.gmra.mrb[0].mxu0 %v71_v47  ;;  %718 = vmatprep.subr.bf16.mxu1 %v876_v0 }
  0x6d   :  { %608 = vmatprep.mubr.msk.f32.mxu0 %vm877_vm0, %v878_v1  ;;  %696 = vmatpush3.bf16.msra.mxu0 %v695_v54 }
  0x6e   :  { %697 = vmatprep.subr.bf16.mxu0 %v876_v0 }
  0x71   :  { %699 = vmatpush3.bf16.msra.mxu0 %v698_v56 }
  0x72   :  { %700 = vmatprep.subr.bf16.mxu0 %v876_v0 }
  0x75   :  { %702 = vmatpush3.bf16.msra.mxu0 %v701_v59 }
  0x76   :  { %703 = vmatprep.subr.bf16.mxu0 %v876_v0 }
  0x79   :  { %705 = vmatpush3.bf16.msra.mxu0 %v704_v62 }
  0x7a   :  { %706 = vmatprep.subr.bf16.mxu0 %v876_v0 }
  0x7d   :  { %708 = vmatpush3.bf16.msra.mxu0 %v707_v3 }
  0x7e   :  { %709 = vmatprep.subr.bf16.mxu0 %v876_v0 }
  0x81   :  { %711 = vmatpush3.bf16.msra.mxu0 %v710_v6 }
  0x82   :  { %712 = vmatprep.subr.bf16.mxu0 %v876_v0 }
  0x85   :  { %714 = vmatpush3.bf16.msra.mxu0 %v713_v9 }
  0x86   :  { %715 = vmatprep.subr.bf16.mxu0 %v876_v0 }
  0x89   :  { %717 = vmatpush3.bf16.msra.mxu0 %v716_v15 }
 0x13f   :  { %v154_v10 = vpop.f32.mrb[0].mxu0 }
 0x140   :  { %v158_v11 = vmax.f32 %v154_v10, 0.0  ;;  %v540_v12 = vpop.f32.mrb[1].mxu0 }
 0x142   :  { %574 = vmatmul.mubr.f32.vlgmr.msra.gmra.mrb[0].mxu1 %v158_v11 }
 0x143   :  { %643 = vmatprep.mubr.msk.f32.mxu1 %vm877_vm0, %v878_v1  ;;  %720 = vmatpush3.bf16.msra.mxu1 %v719_v19  ;;  %v340_v1 = vld [vmem:[#allocation8 + $0x30] sm:$0xff] }
 0x144   :  { %721 = vmatprep.subr.bf16.mxu1 %v876_v0  ;;  %v728_v26 = vpack.c.bf16 %v341_v25, %v340_v1 }
 0x147   :  { %723 = vmatpush3.bf16.msra.mxu1 %v722_v21 }
 0x148   :  { %724 = vmatprep.subr.bf16.mxu1 %v876_v0 }
 0x14b   :  { %726 = vmatpush3.bf16.msra.mxu1 %v725_v24 }
 0x14c   :  { %727 = vmatprep.subr.bf16.mxu1 %v876_v0 }
 0x14f   :  { %729 = vmatpush3.bf16.msra.mxu1 %v728_v26 }
 0x150   :  { %730 = vmatprep.subr.bf16.mxu1 %v876_v0 }
 0x153   :  { %732 = vmatpush3.bf16.msra.mxu1 %v731_v29 }
 0x154   :  { %733 = vmatprep.subr.bf16.mxu1 %v876_v0 }
 0x157   :  { %735 = vmatpush3.bf16.msra.mxu1 %v734_v32 }
 0x158   :  { %736 = vmatprep.subr.bf16.mxu1 %v876_v0 }
 0x15b   :  { %738 = vmatpush3.bf16.msra.mxu1 %v737_v35 }
 0x15c   :  { %739 = vmatprep.subr.bf16.mxu1 %v876_v0 }
 0x15f   :  { %741 = vmatpush3.bf16.msra.mxu1 %v740_v41 }
 0x215   :  { %v241_v36 = vpop.f32.mrb[0].mxu1 }
 0x216   :  { %v245_v37 = vmax.f32 %v241_v36, 0.0  ;;  %v575_v38 = vpop.f32.mrb[1].mxu1 }
 0x218   :  { %609 = vmatmul.mubr.f32.vlgmr.msra.gmra.mrb[2].mxu0 %v245_v37 }
 0x2eb   :  { %v329_v42 = vpop.f32.mrb[2].mxu0 }
 0x2ec   :  { %v333_v43 = vmax.f32 %v329_v42, 0.0  ;;  %v610_v44 = vpop.f32.mrb[3].mxu0 }
 0x2ee   :  { %644 = vmatmul.mubr.f32.vlgmr.msra.gmra.mrb[2].mxu1 %v333_v43 }
 0x3c1   :  { %v416_v45 = vpop.f32.mrb[2].mxu1 }
 0x3c2   :  { %420 = vst [vmem:[#allocation10] sm:$0xff] %v416_v45  ;;  %v645_v46 = vpop.f32.mrb[3].mxu1 }
 0x3c3   :  { %851 = shalt.err (!%p848_p8)
}
 0x3c4   :  { %s852_s1 = scalar_lea.hbm %s1018_s4, 128 }
 0x3c5   :  { %p853_p9 = scmp.ne.s32.totalorder %s1018_s4, %s852_s1  ;;  %p856_p10 = scmp.lt.u32.totalorder %s852_s1, %s1018_s4 }
 0x3c7   :  { %p858_p11 = pnand %p856_p10, %p853_p9 }
 0x3c9   :  { %861 = shalt.err (!%p858_p11)
}
 0x3ca   :  { %430 = dma.vmem_to_hbm [thread:$0]  %s428_s25, 128, %s1018_s4, [#allocation4]  }
 0x3cb   :  { %868 = dma.done.wait [#allocation4], 128  }
 0x3cc   :  { %869 = vsyncadd [#allocation4], 4294967168 }
 0x3cd   :  { %434 = vsyncpa [#allocation3], 1 }
 0x3ce   :  { %435 = vsyncpa [#allocation6], 1 }
 0x3cf   :  { %436 = vsyncpa [#allocation9], 1 }
 0x3d0   :  { %437 = vsyncpa [#allocation4], 1 }

</bundles_post_ra>
